<compile_context>
chip_gen: v7x
topology: tpu7x:2x2x1
jax: 0.10.0
libtpu: 0.0.40
codegen_flags: <defaults>
</compile_context>

<pallas_src>
from collections import deque

import numpy as np
import jax
import jax.numpy as jnp
from jax.experimental import pallas as pl
from jax.experimental.pallas import tpu as pltpu


# ----------------------------------------------------------------------------
# Pallas kernel: full scheduled-sampling loop (grid axis = loop iteration).
# ----------------------------------------------------------------------------
def _sched_sample_loop_kernel(eps_ref, x_ref, y0_ref, wx_ref, wy_ref, u_ref,
                              out_ref, base_ref):
    l = pl.program_id(0)

    @pl.when(l == 0)
    def _init():
        # Conditioning contribution Wx @ x is loop-invariant: compute once and
        # cache in VMEM scratch (halves the per-iteration MXU work).
        base_ref[...] = jnp.dot(wx_ref[...], x_ref[...],
                                preferred_element_type=jnp.float32)
        # y stays resident in the output VMEM block across the whole loop.
        out_ref[...] = y0_ref[...]

    y = out_ref[...].astype(jnp.float32)                          # (Q, B*T)

    # "model": Wavenet stub = 1x1 conv over channels -> logits (Q, B*T)  [MXU]
    logits = base_ref[...] + jnp.dot(wy_ref[...], y,
                                     preferred_element_type=jnp.float32)

    # "sampler": softmax over the channel (sublane) axis              [EUP/XLU]
    m = jnp.max(logits, axis=0, keepdims=True)
    e = jnp.exp(logits - m)
    y_samples = e / jnp.sum(e, axis=0, keepdims=True)

    # mask = (uniform > eps);  y = y_samples*mask + y*(1-mask)  ==  select
    eps = eps_ref[l]
    out_ref[...] = jnp.where(u_ref[0] > eps, y_samples, y).astype(out_ref.dtype)


def scheduled_sample_loop(x, y, wx, wy, eps_list, key):
    """Run all active scheduled-sampling iterations in one fused Pallas call."""
    B, C, T = x.shape
    _, Q, _ = y.shape
    L = len(eps_list)
    if L == 0:
        return y
    BT = B * T

    # Fold batch into the lane (time) axis: channels-first 2-D slabs.
    x2 = jnp.transpose(x, (1, 0, 2)).reshape(C, BT)
    y2 = jnp.transpose(y, (1, 0, 2)).reshape(Q, BT)
    eps_arr = jnp.asarray(eps_list, dtype=jnp.float32)
    # One uniform per iteration per element of y (matches
    # torch.zeros(y.size()).uniform_() > eps), precomputed host-side.
    u = jax.random.uniform(key, (L, Q, BT), dtype=jnp.float32)

    out2 = pl.pallas_call(
        _sched_sample_loop_kernel,
        out_shape=jax.ShapeDtypeStruct((Q, BT), y.dtype),
        grid_spec=pltpu.PrefetchScalarGridSpec(
            num_scalar_prefetch=0,
            grid=(L,),
            in_specs=[
                pl.BlockSpec(memory_space=pltpu.MemorySpace.SMEM),  # eps (L,)
                pl.BlockSpec((C, BT), lambda l: (0, 0)),            # x (const)
                pl.BlockSpec((Q, BT), lambda l: (0, 0)),            # y0 (const)
                pl.BlockSpec((Q, C), lambda l: (0, 0)),             # Wx (const)
                pl.BlockSpec((Q, Q), lambda l: (0, 0)),             # Wy (const)
                pl.BlockSpec((1, Q, BT), lambda l: (l, 0, 0)),      # uniforms
            ],
            out_specs=pl.BlockSpec((Q, BT), lambda l: (0, 0)),      # resident y
            scratch_shapes=[pltpu.VMEM((Q, BT), jnp.float32)],      # Wx @ x
        ),
        compiler_params=pltpu.CompilerParams(
            # The single grid axis carries y iteration -> iteration.
            dimension_semantics=("arbitrary",)),
    )(eps_arr, x2, y2, wx, wy, u)

    # (Q, B*T) -> (B, Q, T)
    return out2.reshape(Q, B, T).transpose(1, 0, 2)


# ----------------------------------------------------------------------------
# Host-side module (scheduling bookkeeping stays in Python, like the original).
# ----------------------------------------------------------------------------
class LinDecay:
    def __init__(self, start_y, end_y, dx):
        self.M = (start_y - end_y) / (dx - 1)
        self.B = start_y

    def __call__(self, x):
        return self.B - self.M * x


class ScheduledSamplerWithPatience:
    def __init__(self, wx, wy, start_loops=0, end_loops=1, start_epsilon=1.0,
                 end_epsilon=0.1, decay_iters=2500, patience=150, threshold=0.2,
                 underloop_prob=0.1, start_decaying=True, rng_seed=1234):
        # "model" + "sampler" are realized by the Pallas kernel using (wx, wy).
        self.wx = wx
        self.wy = wy
        self.start_loops = start_loops
        self.end_loops = end_loops
        self.sample_loops = start_loops
        self.patience = patience
        self.threshold = threshold
        self.underloop_prob = underloop_prob
        self.decaying = start_decaying
        self.decay_iters = decay_iters
        self.decay = LinDecay(start_epsilon, end_epsilon, decay_iters)
        self.start_epsilon = start_epsilon
        self.epsilon = []
        for _ in range(start_loops - 1):
            self.epsilon += [end_epsilon]
        if start_decaying:
            self.epsilon += [start_epsilon]
        else:
            self.epsilon += [end_epsilon]
        self.iteration = 0
        self.loss_sum = 0
        self.loss_memory = deque()
        for _ in range(patience):
            self.loss_memory.append(0)
        self.prev_loss_check = None
        self._key = jax.random.PRNGKey(rng_seed)

    def forward(self, x, y, training=True):
        # Host-side randomness controlling the number of loops (as in PyTorch).
        if np.random.random() < self.underloop_prob:
            if self.sample_loops == 0:
                tmp_sample_loops = 0
            else:
                tmp_sample_loops = int(np.random.randint(self.sample_loops))
        else:
            tmp_sample_loops = self.sample_loops

        # Iterations with epsilon == 1 are skipped (`continue` in the
        # reference); drop them so the fused kernel only runs active ones.
        active_eps = [float(self.epsilon[p]) for p in range(tmp_sample_loops)
                      if self.epsilon[p] != 1]
        if not active_eps:
            return y

        self._key, sub = jax.random.split(self._key)
        return scheduled_sample_loop(x, y, self.wx, self.wy, active_eps, sub)

    def update(self, loss):
        # Pure host-side bookkeeping, identical to the reference.
        if self.decaying is None:
            return
        self.loss_memory.appendleft(loss)
        self.loss_sum += loss
        self.loss_sum -= self.loss_memory.pop()
        av_loss = self.loss_sum / self.patience
        if self.decaying:
            self.epsilon[-1] = self.decay(self.iteration)
            if self.iteration == self.decay_iters - 1:
                if self.sample_loops == self.end_loops:
                    self.decaying = None
                else:
                    self.decaying = False
                    self.iteration = -1
                    self.prev_loss_check = av_loss
        elif self.iteration != 0 and self.iteration % self.patience == 0:
            if self.prev_loss_check is not None:
                if av_loss > self.prev_loss_check + self.threshold:
                    self.sample_loops += 1
                    self.epsilon += [self.start_epsilon]
                    self.iteration = -1
                    self.decaying = True
            self.prev_loss_check = av_loss
        self.iteration += 1


# ----------------------------------------------------------------------------
if __name__ == "__main__":
    B, C, Q, T = 2, 8, 8, 128   # batch, cond channels, quant channels, time

    key = jax.random.PRNGKey(0)
    kx, ky, kwx, kwy = jax.random.split(key, 4)
    x = jax.random.normal(kx, (B, C, T), dtype=jnp.float32)
    y = jax.random.normal(ky, (B, Q, T), dtype=jnp.float32)
    # Deterministic synthetic "model" parameters (1x1 conv weights).
    wx = 0.1 * jax.random.normal(kwx, (Q, C), dtype=jnp.float32)
    wy = 0.1 * jax.random.normal(kwy, (Q, Q), dtype=jnp.float32)

    sampler = ScheduledSamplerWithPatience(
        wx, wy, start_loops=2, end_loops=3,
        start_epsilon=1.0, end_epsilon=0.1, start_decaying=False)

    np.random.seed(0)  # deterministic host-side underloop draw -> 2 iterations
    out = sampler.forward(x, y, training=True)
    out = jax.block_until_ready(out)
    assert out.shape == y.shape and out.dtype == y.dtype
    assert bool(jnp.all(jnp.isfinite(out)))
    print("KERNEL_OK")
</pallas_src>

<mosaic_0001>
module attributes {stable_mosaic.version = 11 : i64} {
  func.func @_sched_sample_loop_kernel(%arg0: i32, %arg1: memref<2xf32, #tpu.memory_space<smem>>, %arg2: memref<8x256xf32, #tpu.memory_space<vmem>>, %arg3: memref<8x256xf32, #tpu.memory_space<vmem>>, %arg4: memref<8x8xf32, #tpu.memory_space<vmem>>, %arg5: memref<8x8xf32, #tpu.memory_space<vmem>>, %arg6: memref<1x8x256xf32, #tpu.memory_space<vmem>>, %arg7: memref<8x256xf32, #tpu.memory_space<vmem>>, %arg8: memref<8x256xf32, #tpu.memory_space<vmem>>) attributes {dimension_semantics = [#tpu.dimension_semantics<arbitrary>], iteration_bounds = array<i64: 2>, scalar_prefetch = 0 : i64, scratch_operands = 1 : i64, tpu.core_type = #tpu.core_type<tc>, window_params = [{transform_indices = @transform_0, window_bounds = array<i64: 2>}, {pipeline_mode = #tpu.pipeline_mode<synchronous>, transform_indices = @transform_1, window_bounds = array<i64: 8, 256>}, {pipeline_mode = #tpu.pipeline_mode<synchronous>, transform_indices = @transform_2, window_bounds = array<i64: 8, 256>}, {pipeline_mode = #tpu.pipeline_mode<synchronous>, transform_indices = @transform_3, window_bounds = array<i64: 8, 8>}, {pipeline_mode = #tpu.pipeline_mode<synchronous>, transform_indices = @transform_4, window_bounds = array<i64: 8, 8>}, {transform_indices = @transform_5, window_bounds = array<i64: 1, 8, 256>}, {pipeline_mode = #tpu.pipeline_mode<synchronous>, transform_indices = @transform_6, window_bounds = array<i64: 8, 256>}]} {
    %c0_i32 = arith.constant 0 : i32
    %0 = arith.cmpi eq, %arg0, %c0_i32 : i32
    %1 = arith.extui %0 : i1 to i32
    %c0_i32_0 = arith.constant 0 : i32
    %2 = arith.cmpi ne, %1, %c0_i32_0 : i32
    scf.if %2 {
      %c0_13 = arith.constant 0 : index
      %c0_14 = arith.constant 0 : index
      %25 = vector.load %arg4[%c0_13, %c0_14] : memref<8x8xf32, #tpu.memory_space<vmem>>, vector<8x8xf32>
      %c0_15 = arith.constant 0 : index
      %c0_16 = arith.constant 0 : index
      %26 = vector.load %arg2[%c0_15, %c0_16] : memref<8x256xf32, #tpu.memory_space<vmem>>, vector<8x256xf32>
      %cst_17 = arith.constant dense<0.000000e+00> : vector<8x256xf32>
      %27 = tpu.matmul %25, %26, %cst_17 {dimension_numbers = #tpu.dot_dimension_numbers<[1], [0], [0], [1], [0, 0, 1, 1], [], []>} : vector<8x8xf32>, vector<8x256xf32>, vector<8x256xf32> -> vector<8x256xf32>
      %c0_18 = arith.constant 0 : index
      %c0_19 = arith.constant 0 : index
      %28 = vector.load %arg8[%c0_18, %c0_19] : memref<8x256xf32, #tpu.memory_space<vmem>>, vector<8x256xf32>
      tpu.vector_store %arg8[%c0_18, %c0_19], %27 {strides = array<i32>} : memref<8x256xf32, #tpu.memory_space<vmem>>, vector<8x256xf32>,
      %c0_20 = arith.constant 0 : index
      %c0_21 = arith.constant 0 : index
      %29 = vector.load %arg3[%c0_20, %c0_21] : memref<8x256xf32, #tpu.memory_space<vmem>>, vector<8x256xf32>
      %c0_22 = arith.constant 0 : index
      %c0_23 = arith.constant 0 : index
      %30 = vector.load %arg7[%c0_22, %c0_23] : memref<8x256xf32, #tpu.memory_space<vmem>>, vector<8x256xf32>
      tpu.vector_store %arg7[%c0_22, %c0_23], %29 {strides = array<i32>} : memref<8x256xf32, #tpu.memory_space<vmem>>, vector<8x256xf32>,
    } else {
    }
    %c0 = arith.constant 0 : index
    %c0_1 = arith.constant 0 : index
    %3 = vector.load %arg7[%c0, %c0_1] : memref<8x256xf32, #tpu.memory_space<vmem>>, vector<8x256xf32>
    %c0_2 = arith.constant 0 : index
    %c0_3 = arith.constant 0 : index
    %4 = vector.load %arg8[%c0_2, %c0_3] : memref<8x256xf32, #tpu.memory_space<vmem>>, vector<8x256xf32>
    %c0_4 = arith.constant 0 : index
    %c0_5 = arith.constant 0 : index
    %5 = vector.load %arg5[%c0_4, %c0_5] : memref<8x8xf32, #tpu.memory_space<vmem>>, vector<8x8xf32>
    %cst = arith.constant dense<0.000000e+00> : vector<8x256xf32>
    %6 = tpu.matmul %5, %3, %cst {dimension_numbers = #tpu.dot_dimension_numbers<[1], [0], [0], [1], [0, 0, 1, 1], [], []>} : vector<8x8xf32>, vector<8x256xf32>, vector<8x256xf32> -> vector<8x256xf32>
    %7 = arith.addf %4, %6 : vector<8x256xf32>
    %cst_6 = arith.constant dense<0xFF800000> : vector<256xf32>
    %8 = vector.multi_reduction <maximumf>, %7, %cst_6 [0] : vector<8x256xf32> to vector<256xf32>
    %9 = vector.shape_cast %8 : vector<256xf32> to vector<1x256xf32>
    %10 = vector.broadcast %9 : vector<1x256xf32> to vector<8x256xf32>
    %11 = arith.subf %7, %10 : vector<8x256xf32>
    %12 = math.exp %11 : vector<8x256xf32>
    %cst_7 = arith.constant dense<0.000000e+00> : vector<256xf32>
    %13 = vector.multi_reduction <add>, %12, %cst_7 [0] : vector<8x256xf32> to vector<256xf32>
    %14 = vector.shape_cast %13 : vector<256xf32> to vector<1x256xf32>
    %15 = vector.broadcast %14 : vector<1x256xf32> to vector<8x256xf32>
    %16 = arith.divf %12, %15 : vector<8x256xf32>
    %17 = arith.index_cast %arg0 : i32 to index
    %18 = memref.load %arg1[%17] : memref<2xf32, #tpu.memory_space<smem>>
    %c0_8 = arith.constant 0 : index
    %c0_9 = arith.constant 0 : index
    %c0_10 = arith.constant 0 : index
    %19 = vector.load %arg6[%c0_8, %c0_9, %c0_10] : memref<1x8x256xf32, #tpu.memory_space<vmem>>, vector<1x8x256xf32>
    %20 = vector.shape_cast %19 : vector<1x8x256xf32> to vector<8x256xf32>
    %21 = vector.broadcast %18 : f32 to vector<8x256xf32>
    %22 = arith.cmpf ogt, %20, %21 : vector<8x256xf32>
    %23 = arith.select %22, %16, %3 : vector<8x256xi1>, vector<8x256xf32>
    %c0_11 = arith.constant 0 : index
    %c0_12 = arith.constant 0 : index
    %24 = vector.load %arg7[%c0_11, %c0_12] : memref<8x256xf32, #tpu.memory_space<vmem>>, vector<8x256xf32>
    tpu.vector_store %arg7[%c0_11, %c0_12], %23 {strides = array<i32>} : memref<8x256xf32, #tpu.memory_space<vmem>>, vector<8x256xf32>,
    return
  }
  func.func @transform_0(%arg0: i32) -> i32 {
    %c0_i32 = arith.constant 0 : i32
    %c0_i32_0 = arith.constant 0 : i32
    return %c0_i32 : i32
  }
  func.func @transform_1(%arg0: i32) -> (i32, i32) {
    %c0_i32 = arith.constant 0 : i32
    %c0_i32_0 = arith.constant 0 : i32
    %c0_i32_1 = arith.constant 0 : i32
    return %c0_i32, %c0_i32_0 : i32, i32
  }
  func.func @transform_2(%arg0: i32) -> (i32, i32) {
    %c0_i32 = arith.constant 0 : i32
    %c0_i32_0 = arith.constant 0 : i32
    %c0_i32_1 = arith.constant 0 : i32
    return %c0_i32, %c0_i32_0 : i32, i32
  }
  func.func @transform_3(%arg0: i32) -> (i32, i32) {
    %c0_i32 = arith.constant 0 : i32
    %c0_i32_0 = arith.constant 0 : i32
    %c0_i32_1 = arith.constant 0 : i32
    return %c0_i32, %c0_i32_0 : i32, i32
  }
  func.func @transform_4(%arg0: i32) -> (i32, i32) {
    %c0_i32 = arith.constant 0 : i32
    %c0_i32_0 = arith.constant 0 : i32
    %c0_i32_1 = arith.constant 0 : i32
    return %c0_i32, %c0_i32_0 : i32, i32
  }
  func.func @transform_5(%arg0: i32) -> (i32, i32, i32) {
    %c0_i32 = arith.constant 0 : i32
    %c0_i32_0 = arith.constant 0 : i32
    %c0_i32_1 = arith.constant 0 : i32
    return %arg0, %c0_i32, %c0_i32_0 : i32, i32, i32
  }
  func.func @transform_6(%arg0: i32) -> (i32, i32) {
    %c0_i32 = arith.constant 0 : i32
    %c0_i32_0 = arith.constant 0 : i32
    %c0_i32_1 = arith.constant 0 : i32
    return %c0_i32, %c0_i32_0 : i32, i32
  }
}

</mosaic_0001>

<bundles_post_ra>
// kernel: tpu_custom_call.1
= control target key start
LH: loop header
LB: loop body
LE: loop exit
PB: predicated region body
PF: predicated region fallthrough
CT: control target
= control target key end

     0   :  { %11 = vsyncpa [#allocation6], 0  ;;  %s1253_s0 = inlined_call_operand.hbm [shape: f32[2], index: 0, kind: input, shape index: {}]   ;;  %s1254_s1 = inlined_call_operand.hbm [shape: f32[8,256], index: 1, kind: input, shape index: {}]   ;;  %s1255_s2 = inlined_call_operand.hbm [shape: f32[8,256], index: 2, kind: input, shape index: {}]   ;;  %s1256_s3 = inlined_call_operand.vmem [shape: f32[8,8], index: 3, kind: input, shape index: {}]   ;;  %s1257_s4 = inlined_call_operand.hbm [shape: f32[8,8], index: 4, kind: input, shape index: {}]   ;;  %s1258_s5 = inlined_call_operand.hbm [shape: f32[2,8,256], index: 5, kind: input, shape index: {}]   ;;  %s1259_s6 = inlined_call_operand.hbm [shape: f32[8,256], index: 6, kind: output, shape index: {}]  }
   0x1   :  { %12 = vsyncpa [#allocation4], 0 }
   0x2   :  { %13 = vsyncpa [#allocation9], 0 }
   0x3   :  { %14 = vsyncpa [#allocation12], 0 }
   0x4   :  { %16 = vsyncpa [#allocation12 + $0x1], 0 }
   0x5   :  { %17 = vsyncpa [#allocation5], 0  ;;  %s989_s21 = smov 0   ;;  %s991_s22 = smov 0  }
   0x6   :  { %s993_s23 = smov 0   ;;  %s995_s24 = smov 0  }
   0x7 LB: > { %s946_s25 = smov [#allocation8]   ;;  %s1010_s27 = sadd.s32 4294967295, %s944_s24   ;;  %s944_s24 = sphi %s995_s24, %s1279_s24   ;;  %s940_s23 = sphi %s993_s23, %s1278_s23   ;;  %s936_s22 = sphi %s991_s22, %s1277_s22   ;;  %s932_s21 = sphi %s989_s21, %s1276_s21  }
   0x8   : > { %s213_s26 = sshll.u32 %s946_s25, 4  ;;  %p621_p0 = scmp.ge.s32.totalorder %s944_s24, 1  ;;  %s214_s26 = int_to_ptr.vmem [resolvable:$true] %s213_s26 }
   0x9   : > { %p1260_p1 = scmp.eq.s32.totalorder %s1010_s27, 0  ;;  %p180_p2 = scmp.lt.s32.totalorder %s944_s24, 3 }
   0xa   : > { %s947_s29 = smov [#allocation7]   ;;  %s948_s8 = smov [#allocation10]  }
   0xb   : > { %p1016_p4 = pnand %p621_p0, %p180_p2  ;;  %s202_s30 = sshll.u32 %s947_s29, 4  ;;  %s1022_s30 = int_to_ptr.vmem [resolvable:$true] %s202_s30 }
   0xc   : > { %s227_s9 = sshll.u32 %s948_s8, 4  ;;  %s741_s12 = scalar_lea.hbm %s1255_s2, 256  ;;  %s1030_s9 = int_to_ptr.vmem [resolvable:$true] %s227_s9 }
   0xd   : > { %s1262_s28 = scalar_select %p1016_p4, 1, 0 }
   0xe   : > { %p666_p5 = pneg %p1016_p4  ;;  %p742_p7 = scmp.ne.s32.totalorder %s1255_s2, %s741_s12 }
   0xf   : > { %p748_p11 = scmp.lt.u32.totalorder %s741_s12, %s1255_s2 }
  0x10   : > { %p1026_p6 = pnand %p666_p5, %p1260_p1 }
  0x12   : > { %p1040_p8 = pneg %p1026_p6 }
  0x14   : > { %p744_p9 = pnand %p1040_p8, %p742_p7 }
  0x16   : > { %p745_p10 = pneg %p744_p9 }
  0x18   : > { %p750_p12 = pnand %p748_p11, %p745_p10 }
  0x1a   : > { %753 = shalt.err (!%p750_p12)
}
  0x1b   : > { %s754_s18 = scalar_lea.vmem %s214_s26, 256  ;;  %p762_p5 = scmp.lt.s32.totalorder %s214_s26, %s214_s26 }
  0x1c   : > { %p755_p13 = scmp.ne.s32.totalorder %s214_s26, %s754_s18  ;;  %p763_p3 = scmp.lt.s32.totalorder %s754_s18, %s754_s18 }
  0x1e   : > { %p757_p0 = pnand %p755_p13, %p1040_p8  ;;  %p764_p1 = por %p763_p3, %p762_p5 }
  0x20   : > { %p758_p2 = pneg %p757_p0 }
  0x22   : > { %p765_p4 = pnand %p764_p1, %p758_p2 }
  0x24   : > { %768 = shalt.err (!%p765_p4)
}
  0x25   : > { %675 = dma.hbm_to_vmem [thread:$0]  (!%p1026_p6), %s1255_s2, 256, %s214_s26, [#allocation9]  }
  0x26   : > { %s769_s8 = scalar_lea.hbm %s1253_s0, 16 }
  0x27   : > { %p770_p7 = scmp.ne.s32.totalorder %s1253_s0, %s769_s8  ;;  %p776_p1 = scmp.lt.u32.totalorder %s769_s8, %s1253_s0 }
  0x29   : > { %p772_p9 = pnand %p770_p7, %p1040_p8 }
  0x2b   : > { %p773_p3 = pneg %p772_p9 }
  0x2d   : > { %p778_p4 = pnand %p776_p1, %p773_p3 }
  0x2f   : > { %781 = shalt.err (!%p778_p4)
}
  0x30   : > { %s949_s14 = smov [#allocation3]   ;;  %s782_s19 = scalar_lea.hbm %s1254_s1, 256 }
  0x31   : > { %669 = dma.hbm_to_smem (!%p1026_p6), %s1253_s0, 16, %s949_s14, [#allocation6]  }
  0x32   : > { %p783_p10 = scmp.ne.s32.totalorder %s1254_s1, %s782_s19  ;;  %p789_p13 = scmp.lt.u32.totalorder %s782_s19, %s1254_s1 }
  0x34   : > { %p785_p11 = pnand %p783_p10, %p1040_p8 }
  0x36   : > { %p786_p12 = pneg %p785_p11 }
  0x38   : > { %p791_p0 = pnand %p789_p13, %p786_p12 }
  0x3a   : > { %794 = shalt.err (!%p791_p0)
}
  0x3b   : > { %s795_s10 = scalar_lea.vmem %s1022_s30, 256  ;;  %p803_p9 = scmp.lt.s32.totalorder %s1022_s30, %s1022_s30 }
  0x3c   : > { %p796_p2 = scmp.ne.s32.totalorder %s1022_s30, %s795_s10  ;;  %p804_p3 = scmp.lt.s32.totalorder %s795_s10, %s795_s10 }
  0x3e   : > { %p798_p5 = pnand %p796_p2, %p1040_p8  ;;  %p805_p1 = por %p804_p3, %p803_p9 }
  0x40   : > { %p799_p7 = pneg %p798_p5 }
  0x42   : > { %p806_p4 = pnand %p805_p1, %p799_p7 }
  0x44   : > { %809 = shalt.err (!%p806_p4)
}
  0x45   : > { %672 = dma.hbm_to_vmem [thread:$0]  (!%p1026_p6), %s1254_s1, 256, %s1022_s30, [#allocation4]  }
  0x46   : > { %s810_s26 = scalar_lea.hbm %s1257_s4, 128 }
  0x47   : > { %p811_p10 = scmp.ne.s32.totalorder %s1257_s4, %s810_s26  ;;  %p817_p13 = scmp.lt.u32.totalorder %s810_s26, %s1257_s4 }
  0x49   : > { %p813_p11 = pnand %p811_p10, %p1040_p8 }
  0x4b   : > { %p814_p12 = pneg %p813_p11 }
  0x4d   : > { %p819_p0 = pnand %p817_p13, %p814_p12 }
  0x4f   : > { %822 = shalt.err (!%p819_p0)
}
  0x50   : > { %s823_s30 = scalar_lea.vmem %s1030_s9, 128  ;;  %p831_p9 = scmp.lt.s32.totalorder %s1030_s9, %s1030_s9 }
  0x51   : > { %p824_p2 = scmp.ne.s32.totalorder %s1030_s9, %s823_s30  ;;  %p832_p3 = scmp.lt.s32.totalorder %s823_s30, %s823_s30 }
  0x53   : > { %p826_p5 = pnand %p824_p2, %p1040_p8  ;;  %p833_p1 = por %p832_p3, %p831_p9 }
  0x55   : > { %p827_p7 = pneg %p826_p5 }
  0x57   : > { %p834_p4 = pnand %p833_p1, %p827_p7 }
  0x59   : > { %837 = shalt.err (!%p834_p4)
}
  0x5a   : > { %678 = dma.hbm_to_vmem [thread:$0]  (!%p1026_p6), %s1257_s4, 128, %s1030_s9, [#allocation9]  }
  0x5b   : > { %s1119_s15 = sadd.s32 1, %s944_s24   ;;  %s135_s7 = sadd.s32 1, %s940_s23 }
  0x5c   : > { %s132_s29 = ssub.s32 %s944_s24, %s1119_s15  ;;  %p142_p8 = scmp.ne.s32.totalorder %s940_s23, %s936_s22 }
  0x5d   : > { %p133_p10 = scmp.eq.s32.totalorder %s132_s29, 0  ;;  %p143_p11 = scmp.eq.s32.totalorder %s944_s24, 0 }
  0x5e   : > { %p148_p12 = scmp.ne.s32.totalorder %s936_s22, %s932_s21  ;;  %p687_p13 = scmp.lt.s32.totalorder %s944_s24, 2 }
  0x5f   : > { %s1131_s8 = scalar_select %p133_p10, %s940_s23, %s135_s7  }
  0x60   : > { %p144_p0 = por %p143_p11, %p142_p8  ;;  %p1265_p2 = scmp.eq.s32.totalorder %s1010_s27, 0 }
  0x61   : > { %s238_s11 = sand.u32 1, %s940_s23   ;;  %s643_s9 = sshll.u32 %s944_s24, 8 }
  0x62   : > { %p1135_p5 = por %p1265_p2, %p148_p12  ;;  %s627_s12 = sshll.u32 %s238_s11, 4 }
  0x63   : > { %s1144_s26 = scalar_lea.hbm %s1258_s5, %s643_s9  ;;  %s242_s21 = scalar_lea.vmem [#allocation11], %s627_s12 }
  0x64   : > { %s250_s16 = sshll.u32 %s242_s21, 4  ;;  %p1146_p6 = pnand %p687_p13, %p144_p0  ;;  %s1150_s16 = int_to_ptr.vmem [resolvable:$true] %s250_s16 }
  0x65   : > { %s239_s24 = scalar_lea.sflag [#allocation12], %s238_s11  ;;  %s838_s18 = scalar_lea.hbm %s1144_s26, 256 }
  0x66   : > { %p839_p7 = scmp.ne.s32.totalorder %s1144_s26, %s838_s18  ;;  %p840_p9 = pneg %p1146_p6 }
  0x67   : > { %s843_s20 = scalar_lea.hbm %s1258_s5, 512  ;;  %p844_p4 = scmp.lt.u32.totalorder %s1144_s26, %s1258_s5 }
  0x68   : > { %p841_p3 = pnand %p840_p9, %p839_p7  ;;  %p845_p8 = scmp.lt.u32.totalorder %s843_s20, %s838_s18 }
  0x69   : > { %p847_p11 = scmp.lt.u32.totalorder %s838_s18, %s1144_s26 }
  0x6a   : > { %p842_p1 = pneg %p841_p3  ;;  %p846_p10 = por %p845_p8, %p844_p4 }
  0x6c   : > { %p848_p12 = por %p847_p11, %p846_p10 }
  0x6e   : > { %p849_p13 = pnand %p848_p12, %p842_p1 }
  0x70   : > { %852 = shalt.err (!%p849_p13)
}
  0x71   : > { %s853_s29 = scalar_lea.vmem %s1150_s16, 256  ;;  %s950_s11 = smov [#allocation11]  }
  0x72   : > { %p854_p0 = scmp.ne.s32.totalorder %s1150_s16, %s853_s29  ;;  %s858_s9 = sshll.u32 %s950_s11, 4  ;;  %s859_s9 = int_to_ptr.vmem [resolvable:$false] %s858_s9 }
  0x73   : > { %s860_s12 = scalar_lea.vmem %s859_s9, 512  ;;  %p861_p3 = scmp.lt.s32.totalorder %s1150_s16, %s859_s9 }
  0x74   : > { %p856_p2 = pnand %p854_p0, %p840_p9  ;;  %p862_p4 = scmp.lt.s32.totalorder %s860_s12, %s853_s29 }
  0x76   : > { %p857_p7 = pneg %p856_p2  ;;  %p863_p8 = por %p862_p4, %p861_p3 }
  0x78   : > { %p864_p10 = pnand %p863_p8, %p857_p7 }
  0x7a   : > { %867 = shalt.err (!%p864_p10)
}
  0x7b   : > { %682 = dma.hbm_to_vmem [thread:$0]  (!%p1146_p6), %s1144_s26, 256, %s1150_s16, %s239_s24  }
  0x7c   : > { %p1268_p1 = scmp.ne.s32.totalorder %s1262_s28, 0 }
  0x7d   : > { %p1269_p9 = scmp.eq.s32.totalorder (!%p1268_p1), %s1010_s27, 0 }
  0x7e   : > { %259 = sbr.rel (%p1268_p1) target bundleno = 651 (0x28b), region = 44 }
  0x85   : > { %911 = dma.done.wait (%p1269_p9), [#allocation6], 16   ;;  %p1270_p11 = pmov %p1269_p9 }
  0x86   : > { %p1271_p12 = pmov %p1269_p9 }
  0x87   : > { %913 = vsyncadd (%p1270_p11), [#allocation6], 4294967280 }
  0x88   : > { %915 = dma.done.wait (%p1271_p12), [#allocation4], 256   ;;  %p1272_p13 = pmov %p1269_p9 }
  0x89   : > { %p1273_p0 = pmov %p1269_p9 }
  0x8a   : > { %917 = vsyncadd (%p1272_p13), [#allocation4], 4294967040 }
  0x8b   : > { %919 = dma.done.wait (%p1273_p0), [#allocation9], 384   ;;  %p1274_p6 = pmov %p1273_p0 }
  0x8c   : > { %s277_s28 = sand.u32 1, %s936_s22  }
  0x8d   : > { %921 = vsyncadd (%p1274_p6), [#allocation9], 4294966912  ;;  %s1192_s13 = sshll.u32 %s277_s28, 4  ;;  %s278_s14 = scalar_lea.sflag [#allocation12], %s277_s28 }
  0x8e   : > { %s281_s26 = scalar_lea.vmem [#allocation11], %s1192_s13 }
  0x8f   : > { %923 = dma.done.wait (%p1135_p5), %s278_s14, 256  }
  0x90   : > { %925 = vsyncadd (%p1135_p5), %s278_s14, 4294967040 }
  0x91   : > { %286 = sfence }
  0x92   : > { %p1275_p2 = scmp.ne.s32.totalorder %s1010_s27, 0 }
  0x93   : > { %v312_v0 = vld [vmem:[#allocation7 + $0x8] sm:$0xff] (!%p1275_p2)  ;;  %v311_v1 = vld [vmem:[#allocation7] sm:$0xff] (!%p1275_p2)  ;;  %vm313_vm0 = vcmask (!%p1275_p2), 64512   ;;  %v951_v3 = vmov (!%p1275_p2), 0.0   ;;  %v390_v4 = vld [vmem:[#allocation8] sm:$0xff] (!%p1275_p2) }
  0x94   : > { %309 = sbr.rel (%p1275_p2) target bundleno = 364 (0x16c), region = 68  ;;  %v310_v2 = vld [vmem:[%s1256_s3] sm:$0xff] (!%p1275_p2)  ;;  %317 = vmatprep.subr.mxu0 (!%p1275_p2), %v312_v0  ;;  %381 = vmatprep.mubr.f32.mxu0 (!%p1275_p2), %v951_v3  ;;  %v391_v5 = vld [vmem:[#allocation8 + $0x8] sm:$0xff] (!%p1275_p2)  ;;  %392 = vst [vmem:[#allocation13] sm:$0xff] (!%p1275_p2), %v390_v4 }
  0x95   : > { %318 = vmatpush1.msra.mxu0 (!%p1275_p2), %v311_v1  ;;  %393 = vst [vmem:[#allocation13 + $0x8] sm:$0xff] (!%p1275_p2), %v391_v5 }
  0x96   : > { %637 = vmatmul.mubr.msk.f32.vlgmr.msra.gmra.mrb[0].mxu0 (!%p1275_p2), %vm313_vm0, %v310_v2 }
 0x169   : > { %v383_v6 = vpop.f32.mrb[0].mxu0 }
 0x16a   : > { %388 = vst [vmem:[#allocation2] sm:$0xff] %v383_v6  ;;  %v385_v7 = vpop.f32.mrb[1].mxu0 }
 0x16b   : > { %389 = vst [vmem:[#allocation2 + $0x8] sm:$0xff] %v385_v7 }
 0x16c PF: > { %v1206_v9 = vld [vmem:[#allocation13] sm:$0xff]  ;;  %v398_v10 = vld [vmem:[#allocation10] sm:$0xff]  ;;  %vm399_vm1 = vcmask 64512   ;;  %v952_v11 = vmov 0.0   ;;  %s510_s10 = sld [smem:[#allocation3 + %s1010_s27]]  ;;  %s953_s17 = smov [#allocation13]  }
 0x16d   : > { %v1204_v8 = vld [vmem:[#allocation13 + $0x8] sm:$0xff]  ;;  %467 = vmatprep.mubr.f32.mxu0 %v952_v11  ;;  %v511_v48 = vld [vmem:[%s281_s26] sm:$0xff]  ;;  %s527_s24 = sshll.u32 %s953_s17, 4  ;;  %p692_p5 = scmp.eq.s32.totalorder %s1010_s27, 1  ;;  %s528_s24 = int_to_ptr.vmem [resolvable:$true] %s527_s24 }
 0x16e   : > { %403 = vmatprep.subr.mxu0 %v1204_v8  ;;  %v512_v50 = vld [vmem:[%s281_s26 + $0x8] sm:$0xff]  ;;  %s868_s18 = scalar_lea.vmem %s528_s24, 256  ;;  %p875_p8 = scmp.lt.s32.totalorder %s528_s24, %s528_s24 }
 0x16f   : > { %404 = vmatpush1.msra.mxu0 %v1206_v9  ;;  %p869_p7 = scmp.ne.s32.totalorder %s528_s24, %s868_s18  ;;  %p876_p10 = scmp.lt.s32.totalorder %s868_s18, %s868_s18 }
 0x170   : > { %638 = vmatmul.mubr.msk.f32.vlgmr.msra.gmra.mrb[0].mxu0 %vm399_vm1, %v398_v10 }
 0x171   : > { %v396_v12 = vld [vmem:[#allocation2] sm:$0xff]  ;;  %p870_p3 = pnand %p869_p7, %p692_p5  ;;  %p877_p1 = por %p876_p10, %p875_p8 }
 0x172   : > { %v397_v13 = vld [vmem:[#allocation2 + $0x8] sm:$0xff]  ;;  %v513_v49 = vstv %s510_s10 }
 0x173   : > { %vm514_vm2 = vcmp.gt.f32.partialorder %v511_v48, %v513_v49  ;;  %vm515_vm3 = vcmp.gt.f32.partialorder %v512_v50, %v513_v49  ;;  %p871_p4 = pneg %p870_p3 }
 0x175   : > { %p878_p9 = pnand %p877_p1, %p871_p4 }
 0x243   : > { %v469_v14 = vpop.f32.mrb[0].mxu0 }
 0x244   : > { %v474_v15 = vadd.f32 %v469_v14, %v396_v12  ;;  %v471_v16 = vpop.f32.mrb[1].mxu0 }
 0x245   : > { %v475_v17 = vadd.f32 %v471_v16, %v397_v13 }
 0x246   : > { %v476_v18 = vrot.slane %v474_v15, 4 }
 0x247   : > { %v482_v19 = vrot.slane %v475_v17, 4 }
 0x248   : > { %v477_v20 = vmax.f32 %v474_v15, %v476_v18 }
 0x249   : > { %v483_v21 = vmax.f32 %v475_v17, %v482_v19 }
 0x24a   : > { %v478_v22 = vrot.slane %v477_v20, 2 }
 0x24b   : > { %v484_v23 = vrot.slane %v483_v21, 2 }
 0x24c   : > { %v479_v24 = vmax.f32 %v477_v20, %v478_v22 }
 0x24d   : > { %v485_v25 = vmax.f32 %v483_v21, %v484_v23 }
 0x24e   : > { %v480_v26 = vrot.slane %v479_v24, 1 }
 0x24f   : > { %v486_v27 = vrot.slane %v485_v25, 1 }
 0x250   : > { %v481_v28 = vmax.f32 %v479_v24, %v480_v26 }
 0x251   : > { %v487_v29 = vmax.f32 %v485_v25, %v486_v27 }
 0x252   : > { %v488_v30 = vsub.f32 %v474_v15, %v481_v28 }
 0x253   : > { %v489_v31 = vsub.f32 %v475_v17, %v487_v29 }
 0x254   : > { %v490_v32 = vmul.f32 1.442695, %v488_v30 }
 0x255   : > { %v492_v33 = vmul.f32 1.442695, %v489_v31 }
 0x256   : > { %733 = vpow2.f32 %v490_v32 }
 0x257   : > { %735 = vpow2.f32 %v492_v33 }
 0x260   : > { %v734_v34 = vpop.eup %733 }
 0x261   : > { %v736_v35 = vpop.eup %735  ;;  %v494_v36 = vrot.slane %v734_v34, 4 }
 0x262   : > { %v500_v37 = vrot.slane %v736_v35, 4 }
 0x263   : > { %v495_v38 = vadd.f32 %v734_v34, %v494_v36 }
 0x264   : > { %v501_v39 = vadd.f32 %v736_v35, %v500_v37 }
 0x265   : > { %v496_v40 = vrot.slane %v495_v38, 2 }
 0x266   : > { %v502_v41 = vrot.slane %v501_v39, 2 }
 0x267   : > { %v497_v42 = vadd.f32 %v496_v40, %v495_v38 }
 0x268   : > { %v503_v43 = vadd.f32 %v502_v41, %v501_v39 }
 0x269   : > { %v498_v44 = vrot.slane %v497_v42, 1 }
 0x26a   : > { %v504_v45 = vrot.slane %v503_v43, 1 }
 0x26b   : > { %v499_v46 = vadd.f32 %v498_v44, %v497_v42 }
 0x26c   : > { %v505_v47 = vadd.f32 %v504_v45, %v503_v43 }
 0x26d   : > { %737 = vrcp.f32 %v499_v46 }
 0x26e   : > { %739 = vrcp.f32 %v505_v47 }
 0x277   : > { %v738_v51 = vpop.eup %737 }
 0x278   : > { %v740_v52 = vpop.eup %739  ;;  %v507_v53 = vmul.f32 %v738_v51, %v734_v34 }
 0x279   : > { %v509_v54 = vmul.f32 %v740_v52, %v736_v35 }
 0x27a   : > { %v516_v55 = vsel %vm514_vm2, %v507_v53, %v1206_v9 }
 0x27b   : > { %v517_v56 = vsel %vm515_vm3, %v509_v54, %v1204_v8  ;;  %518 = vst [vmem:[#allocation13] sm:$0xff] %v516_v55 }
 0x27c   : > { %519 = vst [vmem:[#allocation13 + $0x8] sm:$0xff] %v517_v56 }
 0x27d   : > { %881 = shalt.err (!%p878_p9)
}
 0x27e   : > { %s882_s20 = scalar_lea.hbm %s1259_s6, 256 }
 0x27f   : > { %p883_p11 = scmp.ne.s32.totalorder %s1259_s6, %s882_s20  ;;  %p888_p0 = scmp.lt.u32.totalorder %s882_s20, %s1259_s6 }
 0x281   : > { %p884_p12 = pnand %p883_p11, %p692_p5 }
 0x283   : > { %p885_p13 = pneg %p884_p12 }
 0x285   : > { %p890_p6 = pnand %p888_p0, %p885_p13 }
 0x287   : > { %893 = shalt.err (!%p890_p6)
}
 0x288   : > { %663 = dma.vmem_to_hbm [thread:$0]  (%p692_p5), %s528_s24, 256, %s1259_s6, [#allocation5]  }
 0x289   : > { %927 = dma.done.wait (%p692_p5), [#allocation5], 256  }
 0x28a   : > { %929 = vsyncadd (%p692_p5), [#allocation5], 4294967040 }
 0x28b PF: > { %p20_p2 = scmp.ge.s32.totalorder %s1119_s15, 4   ;;  %s1276_s21 = smov %s936_s22 }
 0x28c   : > { %s1277_s22 = smov %s940_s23  ;;  %s1278_s23 = smov %s1131_s8 }
 0x28d   : > { %s1279_s24 = smov %s1119_s15  ;;  %22 = sbr.rel (!%p20_p2) target bundleno = 7 (0x7), region = 103 }
 0x294   :  { %540 = vsyncpa [#allocation4], 1 }
 0x295   :  { %542 = vsyncpa [#allocation4 + $0x1], 1 }
 0x296   :  { %543 = vsyncpa [#allocation9], 1 }
 0x297   :  { %544 = vsyncpa [#allocation12], 1 }
 0x298   :  { %546 = vsyncpa [#allocation12 + $0x1], 1 }
 0x299   :  { %547 = vsyncpa [#allocation5], 1 }
 0x29a   :  { %549 = vsyncpa [#allocation5 + $0x1], 1 }
 0x29b   :  { %550 = vsyncpa [#allocation6], 1 }
 0x29c   :  { %552 = vsyncpa [#allocation6 + $0x1], 1 }

</bundles_post_ra>
